<compile_context>
chip_gen: v6e
topology: v6e:2x2x1
jax: 0.10.0
libtpu: 0.0.40
codegen_flags: <defaults>
</compile_context>

<pallas_src>
import jax
import jax.numpy as jnp
from jax.experimental import pallas as pl
from jax.experimental.pallas import tpu as pltpu

D_VIT = 768    # DINOv2-base hidden size
D_HID = 128    # fc3 out features
D_OUT = 2      # fc4 out features
D_PAD = 128    # lane-dense padding for the fc4 output / weights
TB_MAX = 1024  # batch tile cap (multiple of 8); ~4 MiB double-buffered in bf16


def head_kernel(x_ref, w3_ref, b3_ref, w4_ref, b4_ref, o_ref):
    # x_ref already holds ONLY the CLS tokens of this batch tile (BlockSpec over
    # the (B, S*768) reshaped sequence output), delivered by the auto-pipeline.
    x = x_ref[...].astype(jnp.bfloat16)                        # (TB, 768) bf16
    h = jnp.dot(x, w3_ref[...], preferred_element_type=jnp.float32)
    h = jnp.maximum(h + b3_ref[...], 0.0)                      # f32 epilogue (v5e-safe)
    y = jnp.dot(h.astype(jnp.bfloat16), w4_ref[...],
                preferred_element_type=jnp.float32)
    o_ref[...] = (y + b4_ref[...]).astype(o_ref.dtype)         # lane-dense bf16 store


def _batch_semantics(num_tiles):
    # Only CORE_PARALLEL actually shards a grid axis across v7x's two
    # TensorCores; use it when there is real work to split.  PARALLEL otherwise.
    sem = pltpu.PARALLEL
    if num_tiles >= 2:
        try:
            if "v7" in jax.devices()[0].device_kind.lower():
                sem = pltpu.CORE_PARALLEL
        except Exception:
            pass
    return (sem,)


def regression_head(seq_output, kp):
    B, S, D = seq_output.shape
    assert D == D_VIT
    # Free, layout-preserving reshape: row r's first 768 elements are its CLS token.
    seq2d = seq_output.reshape(B, S * D)

    TB = min(TB_MAX, B)            # TB == B (full dim) or a multiple of 8
    num_tiles = pl.cdiv(B, TB)     # partial last tile -> masked edge stores

    out = pl.pallas_call(
        head_kernel,
        out_shape=jax.ShapeDtypeStruct((B, D_PAD), jnp.bfloat16),
        grid=(num_tiles,),
        in_specs=[
            # Fused CLS extraction as an auto-pipelined BlockSpec (prefetches i+1).
            pl.BlockSpec((TB, D_VIT), lambda i: (i, 0)),
            pl.BlockSpec((D_VIT, D_HID), lambda i: (0, 0)),   # w3 bf16, VMEM-resident
            pl.BlockSpec((1, D_HID), lambda i: (0, 0)),       # b3 f32
            pl.BlockSpec((D_HID, D_PAD), lambda i: (0, 0)),   # w4 bf16, zero-padded
            pl.BlockSpec((1, D_PAD), lambda i: (0, 0)),       # b4 f32, zero-padded
        ],
        out_specs=pl.BlockSpec((TB, D_PAD), lambda i: (i, 0)),
        compiler_params=pltpu.CompilerParams(
            dimension_semantics=_batch_semantics(num_tiles)),
    )(seq2d, kp["w3"], kp["b3"], kp["w4"], kp["b4"])
    # Drop lane padding, return the module's f32 output (tiny (B,2) op, fused by jit).
    return out[:, :D_OUT].astype(jnp.float32)


@jax.jit
def regression_model_forward(seq_output, kernel_params):
    return regression_head(seq_output, kernel_params)


def init_params(key):
    # nn.Linear default init: U(-1/sqrt(fan_in), 1/sqrt(fan_in)).
    # Weights stored already transposed (in_features, out_features) for x @ W.
    k3w, k3b, k4w, k4b = jax.random.split(key, 4)
    lim3 = 1.0 / jnp.sqrt(jnp.float32(D_VIT))
    lim4 = 1.0 / jnp.sqrt(jnp.float32(D_HID))
    return {
        "w3": jax.random.uniform(k3w, (D_VIT, D_HID), jnp.float32, -lim3, lim3),
        "b3": jax.random.uniform(k3b, (D_HID,), jnp.float32, -lim3, lim3),
        "w4": jax.random.uniform(k4w, (D_HID, D_OUT), jnp.float32, -lim4, lim4),
        "b4": jax.random.uniform(k4b, (D_OUT,), jnp.float32, -lim4, lim4),
    }


def pack_params(p):
    # Kernel-side operand prep: bf16 weights (explicit perf/accuracy tradeoff),
    # f32 biases, lane-dense zero-padded fc4.
    w4p = jnp.zeros((D_HID, D_PAD), jnp.float32).at[:, :D_OUT].set(p["w4"])
    b4p = jnp.zeros((1, D_PAD), jnp.float32).at[0, :D_OUT].set(p["b4"])
    return {
        "w3": p["w3"].astype(jnp.bfloat16),
        "b3": p["b3"].reshape(1, D_HID).astype(jnp.float32),
        "w4": w4p.astype(jnp.bfloat16),
        "b4": b4p,
    }


if __name__ == "__main__":
    key = jax.random.PRNGKey(0)
    kparam_key, kx = jax.random.split(key)
    params = init_params(kparam_key)
    kparams = pack_params(params)

    B, S = 2, 8  # small stand-in for DINOv2's 257 tokens; hidden stays 768
    # Backbone sequence output consumed in bf16 (halves dominant CLS HBM read);
    # f32 inputs also work — the kernel casts per tile.
    seq_output = jax.random.normal(kx, (B, S, D_VIT), jnp.float32).astype(jnp.bfloat16)

    out = jax.block_until_ready(regression_model_forward(seq_output, kparams))

    # Pure-JAX f32 reference (kernel uses bf16 weights/IO -> looser tolerance).
    cls = seq_output[:, 0, :].astype(jnp.float32)
    ref = jnp.maximum(cls @ params["w3"] + params["b3"], 0.0) @ params["w4"] + params["b4"]
    assert out.shape == (B, D_OUT)
    assert jnp.allclose(out, ref, atol=3e-2, rtol=3e-2), float(jnp.max(jnp.abs(out - ref)))
    print("KERNEL_OK")
</pallas_src>

<mosaic_0001>
module attributes {stable_mosaic.version = 11 : i64} {
  func.func @head_kernel(%arg0: i32, %arg1: memref<2x768xbf16, #tpu.memory_space<vmem>>, %arg2: memref<768x128xbf16, #tpu.memory_space<vmem>>, %arg3: memref<1x128xf32, #tpu.memory_space<vmem>>, %arg4: memref<128x128xbf16, #tpu.memory_space<vmem>>, %arg5: memref<1x128xf32, #tpu.memory_space<vmem>>, %arg6: memref<2x128xbf16, #tpu.memory_space<vmem>>) attributes {dimension_semantics = [#tpu.dimension_semantics<parallel>], iteration_bounds = array<i64: 1>, scalar_prefetch = 0 : i64, scratch_operands = 0 : i64, tpu.core_type = #tpu.core_type<tc>, window_params = [{transform_indices = @transform_0, window_bounds = array<i64: 2, 768>}, {pipeline_mode = #tpu.pipeline_mode<synchronous>, transform_indices = @transform_1, window_bounds = array<i64: 768, 128>}, {pipeline_mode = #tpu.pipeline_mode<synchronous>, transform_indices = @transform_2, window_bounds = array<i64: 1, 128>}, {pipeline_mode = #tpu.pipeline_mode<synchronous>, transform_indices = @transform_3, window_bounds = array<i64: 128, 128>}, {pipeline_mode = #tpu.pipeline_mode<synchronous>, transform_indices = @transform_4, window_bounds = array<i64: 1, 128>}, {transform_indices = @transform_5, window_bounds = array<i64: 2, 128>}]} {
    %c0 = arith.constant 0 : index
    %c0_0 = arith.constant 0 : index
    %0 = vector.load %arg1[%c0, %c0_0] : memref<2x768xbf16, #tpu.memory_space<vmem>>, vector<2x768xbf16>
    %c0_1 = arith.constant 0 : index
    %c0_2 = arith.constant 0 : index
    %1 = vector.load %arg2[%c0_1, %c0_2] : memref<768x128xbf16, #tpu.memory_space<vmem>>, vector<768x128xbf16>
    %cst = arith.constant dense<0.000000e+00> : vector<2x128xf32>
    %2 = tpu.matmul %0, %1, %cst {dimension_numbers = #tpu.dot_dimension_numbers<[1], [0], [0], [1], [0, 0, 1, 1], [], []>} : vector<2x768xbf16>, vector<768x128xbf16>, vector<2x128xf32> -> vector<2x128xf32>
    %c0_3 = arith.constant 0 : index
    %c0_4 = arith.constant 0 : index
    %3 = vector.load %arg3[%c0_3, %c0_4] : memref<1x128xf32, #tpu.memory_space<vmem>>, vector<1x128xf32>
    %4 = vector.broadcast %3 : vector<1x128xf32> to vector<2x128xf32>
    %5 = arith.addf %2, %4 : vector<2x128xf32>
    %cst_5 = arith.constant 0.000000e+00 : f32
    %6 = vector.broadcast %cst_5 : f32 to vector<2x128xf32>
    %7 = arith.maximumf %5, %6 : vector<2x128xf32>
    %8 = arith.truncf %7 : vector<2x128xf32> to vector<2x128xbf16>
    %c0_6 = arith.constant 0 : index
    %c0_7 = arith.constant 0 : index
    %9 = vector.load %arg4[%c0_6, %c0_7] : memref<128x128xbf16, #tpu.memory_space<vmem>>, vector<128x128xbf16>
    %cst_8 = arith.constant dense<0.000000e+00> : vector<2x128xf32>
    %10 = tpu.matmul %8, %9, %cst_8 {dimension_numbers = #tpu.dot_dimension_numbers<[1], [0], [0], [1], [0, 0, 1, 1], [], []>} : vector<2x128xbf16>, vector<128x128xbf16>, vector<2x128xf32> -> vector<2x128xf32>
    %c0_9 = arith.constant 0 : index
    %c0_10 = arith.constant 0 : index
    %11 = vector.load %arg5[%c0_9, %c0_10] : memref<1x128xf32, #tpu.memory_space<vmem>>, vector<1x128xf32>
    %12 = vector.broadcast %11 : vector<1x128xf32> to vector<2x128xf32>
    %13 = arith.addf %10, %12 : vector<2x128xf32>
    %14 = arith.truncf %13 : vector<2x128xf32> to vector<2x128xbf16>
    %c0_11 = arith.constant 0 : index
    %c0_12 = arith.constant 0 : index
    %15 = vector.load %arg6[%c0_11, %c0_12] : memref<2x128xbf16, #tpu.memory_space<vmem>>, vector<2x128xbf16>
    tpu.vector_store %arg6[%c0_11, %c0_12], %14 {strides = array<i32>} : memref<2x128xbf16, #tpu.memory_space<vmem>>, vector<2x128xbf16>,
    return
  }
  func.func @transform_0(%arg0: i32) -> (i32, i32) {
    %c0_i32 = arith.constant 0 : i32
    %c0_i32_0 = arith.constant 0 : i32
    return %arg0, %c0_i32 : i32, i32
  }
  func.func @transform_1(%arg0: i32) -> (i32, i32) {
    %c0_i32 = arith.constant 0 : i32
    %c0_i32_0 = arith.constant 0 : i32
    %c0_i32_1 = arith.constant 0 : i32
    return %c0_i32, %c0_i32_0 : i32, i32
  }
  func.func @transform_2(%arg0: i32) -> (i32, i32) {
    %c0_i32 = arith.constant 0 : i32
    %c0_i32_0 = arith.constant 0 : i32
    %c0_i32_1 = arith.constant 0 : i32
    return %c0_i32, %c0_i32_0 : i32, i32
  }
  func.func @transform_3(%arg0: i32) -> (i32, i32) {
    %c0_i32 = arith.constant 0 : i32
    %c0_i32_0 = arith.constant 0 : i32
    %c0_i32_1 = arith.constant 0 : i32
    return %c0_i32, %c0_i32_0 : i32, i32
  }
  func.func @transform_4(%arg0: i32) -> (i32, i32) {
    %c0_i32 = arith.constant 0 : i32
    %c0_i32_0 = arith.constant 0 : i32
    %c0_i32_1 = arith.constant 0 : i32
    return %c0_i32, %c0_i32_0 : i32, i32
  }
  func.func @transform_5(%arg0: i32) -> (i32, i32) {
    %c0_i32 = arith.constant 0 : i32
    %c0_i32_0 = arith.constant 0 : i32
    return %arg0, %c0_i32 : i32, i32
  }
}

</mosaic_0001>

<bundles_post_ra>
// kernel: regression_model_forward.1
= control target key start
LH: loop header
LB: loop body
LE: loop exit
PB: predicated region body
PF: predicated region fallthrough
CT: control target
= control target key end

     0   :  { %10 = vsyncpa [#allocation3], 0  ;;  %s959_s18 = smov [#allocation2]   ;;  %s1034_s0 = inlined_call_operand.vmem [shape: bf16[2,6144], index: 0, kind: input, shape index: {}]   ;;  %s1035_s1 = inlined_call_operand.hbm [shape: bf16[768,128], index: 1, kind: input, shape index: {}]   ;;  %s1036_s2 = inlined_call_operand.vmem [shape: f32[1,128], index: 2, kind: input, shape index: {}]   ;;  %s1037_s3 = inlined_call_operand.vmem [shape: bf16[128,128], index: 3, kind: input, shape index: {}]   ;;  %s1038_s4 = inlined_call_operand.vmem [shape: f32[1,128], index: 4, kind: input, shape index: {}]   ;;  %s1039_s5 = inlined_call_operand.vmem [shape: bf16[2,128], index: 5, kind: output, shape index: {}]  }
   0x1   :  { %s18_s19 = sshll.u32 %s959_s18, 4  ;;  %s19_s19 = int_to_ptr.vmem [resolvable:$true] %s18_s19 }
   0x2   :  { %s945_s20 = scalar_lea.vmem %s19_s19, 6144  ;;  %p950_p1 = scmp.lt.s32.totalorder %s19_s19, %s19_s19 }
   0x3   :  { %p946_p0 = scmp.ne.s32.totalorder %s19_s19, %s945_s20  ;;  %p951_p2 = scmp.lt.s32.totalorder %s945_s20, %s945_s20 }
   0x5   :  { %p952_p3 = por %p951_p2, %p950_p1 }
   0x7   :  { %p953_p4 = pnand %p952_p3, %p946_p0 }
   0x9   :  { %956 = shalt.err (!%p953_p4)
}
   0xa   :  { %s960_s21 = smov 64   ;;  %s961_s22 = smov 4  }
   0xb   :  { %24 = dma.hbm_to_vmem [thread:$0]  %s1035_s1, 6144, %s19_s19, [#allocation3], %s960_s21, %s960_s21, %s961_s22  }
   0xc   :  { %957 = dma.done.wait [#allocation3], 6144  }
   0xd   :  { %958 = vsyncadd [#allocation3], 4294961152  ;;  %v880_v0 = vld [vmem:[#allocation2 + $0x78] sm:$0xff]   ;;  %v884_v4 = vld [vmem:[#allocation2 + $0x70] sm:$0xff]   ;;  %v962_v21 = vmov 1966171168   ;;  %v144_v23 = vlaneseq }
   0xe   :  { %v881_v1 = vld [vmem:[#allocation2 + $0x38] sm:$0xff]   ;;  %779 = vmatprep.subr.bf16.mxu0 %v880_v0  ;;  %v885_v5 = vld [vmem:[#allocation2 + $0x30] sm:$0xff]   ;;  %v888_v8 = vld [vmem:[#allocation2 + $0x68] sm:$0xff]   ;;  %v142_v22 = vunpack.c.l.s4 %v962_v21  ;;  %vm964_vm0 = vmmov 0  }
   0xf   :  { %v882_v2 = vld [vmem:[#allocation2 + $0xf8] sm:$0xff]   ;;  %780 = vmatpush3.bf16.msra.mxu0 %v881_v1  ;;  %v886_v6 = vld [vmem:[#allocation2 + $0xf0] sm:$0xff]   ;;  %v889_v9 = vld [vmem:[#allocation2 + $0x28] sm:$0xff]   ;;  %v145_v29 = vshrl.u32 %v144_v23, 7 }
  0x10   :  { %v883_v3 = vld [vmem:[#allocation2 + $0xb8] sm:$0xff]   ;;  %801 = vmatprep.subr.bf16.mxu1 %v882_v2  ;;  %781 = vmatprep.subr.bf16.mxu0 %v884_v4  ;;  %v887_v7 = vld [vmem:[#allocation2 + $0xb0] sm:$0xff]   ;;  %v890_v10 = vld [vmem:[#allocation2 + $0xe8] sm:$0xff]   ;;  %v143_v28 = vunpack.c.0.s8 %v142_v22 }
  0x11   :  { %802 = vmatpush3.bf16.msra.mxu1 %v883_v3  ;;  %v891_v11 = vld [vmem:[#allocation2 + $0xa8] sm:$0xff]   ;;  %v892_v12 = vld [vmem:[#allocation2 + $0x60] sm:$0xff]   ;;  %v896_v16 = vld [vmem:[#allocation2 + $0x58] sm:$0xff]   ;;  %v963_v3 = vmov 0.0  }
  0x12   :  { %803 = vmatprep.subr.bf16.mxu1 %v886_v6  ;;  %v893_v13 = vld [vmem:[#allocation2 + $0x20] sm:$0xff]   ;;  %v897_v17 = vld [vmem:[#allocation2 + $0x18] sm:$0xff]   ;;  %v900_v20 = vld [vmem:[#allocation2 + $0x50] sm:$0xff]   ;;  %v146_v34 = vsub.s32 %v143_v28, %v145_v29 }
  0x13   :  { %782 = vmatpush3.bf16.msra.mxu0 %v885_v5  ;;  %v894_v14 = vld [vmem:[#allocation2 + $0xe0] sm:$0xff]   ;;  %v898_v18 = vld [vmem:[#allocation2 + $0xd8] sm:$0xff]   ;;  %v901_v24 = vld [vmem:[#allocation2 + $0x10] sm:$0xff]  }
  0x14   :  { %783 = vmatprep.subr.bf16.mxu0 %v888_v8  ;;  %v895_v15 = vld [vmem:[#allocation2 + $0xa0] sm:$0xff]   ;;  %v899_v19 = vld [vmem:[#allocation2 + $0x98] sm:$0xff]   ;;  %v902_v25 = vld [vmem:[#allocation2 + $0xd0] sm:$0xff]  }
  0x15   :  { %804 = vmatpush3.bf16.msra.mxu1 %v887_v7  ;;  %v903_v26 = vld [vmem:[#allocation2 + $0x90] sm:$0xff]   ;;  %v904_v27 = vld [vmem:[#allocation2 + $0x48] sm:$0xff]   ;;  %v908_v33 = vld [vmem:[#allocation2 + $0x40] sm:$0xff]  }
  0x16   :  { %805 = vmatprep.subr.bf16.mxu1 %v890_v10  ;;  %v905_v30 = vld [vmem:[#allocation2 + $0x8] sm:$0xff]   ;;  %v909_v35 = vld [vmem:[#allocation2] sm:$0xff]   ;;  %v913_v41 = vld [vmem:[#allocation2 + $0x178] sm:$0xff]  }
  0x17   :  { %784 = vmatpush3.bf16.msra.mxu0 %v889_v9  ;;  %v906_v31 = vld [vmem:[#allocation2 + $0xc8] sm:$0xff]   ;;  %v910_v36 = vld [vmem:[#allocation2 + $0xc0] sm:$0xff]   ;;  %v914_v46 = vld [vmem:[#allocation2 + $0x138] sm:$0xff]  }
  0x18   :  { %785 = vmatprep.subr.bf16.mxu0 %v892_v12  ;;  %v907_v32 = vld [vmem:[#allocation2 + $0x88] sm:$0xff]   ;;  %v35_v37 = vld [vmem:[%s1034_s0] sm:$0x3f]  ;;  %v915_v49 = vld [vmem:[#allocation2 + $0x170] sm:$0xff]  }
  0x19   :  { %806 = vmatpush3.bf16.msra.mxu1 %v891_v11  ;;  %v140_v38 = vcombine.high %v35_v37, %v35_v37  ;;  %v147_v39 = vrot.slane %v35_v37, %v146_v34  ;;  %v912_v40 = vld [vmem:[#allocation2 + $0x80] sm:$0xff]   ;;  %v916_v52 = vld [vmem:[#allocation2 + $0x130] sm:$0xff]   ;;  %v917_v53 = vld [vmem:[#allocation2 + $0x168] sm:$0xff]  }
  0x1a   :  { %807 = vmatprep.subr.bf16.mxu1 %v894_v14  ;;  %v918_v54 = vld [vmem:[#allocation2 + $0x128] sm:$0xff]   ;;  %v919_v55 = vld [vmem:[#allocation2 + $0x160] sm:$0xff]   ;;  %v921_v57 = vld [vmem:[#allocation2 + $0x158] sm:$0xff]  }
  0x1b   :  { %786 = vmatpush3.bf16.msra.mxu0 %v893_v13  ;;  %v155_v42 = vcombine.high %v147_v39, %v147_v39  ;;  %v163_v43 = vrot.slane %v147_v39, %v146_v34  ;;  %v154_v44 = vrot.slane %v140_v38, %v146_v34  ;;  %v920_v56 = vld [vmem:[#allocation2 + $0x120] sm:$0xff]   ;;  %v922_v58 = vld [vmem:[#allocation2 + $0x118] sm:$0xff]   ;;  %v923_v59 = vld [vmem:[#allocation2 + $0x150] sm:$0xff]  }
  0x1c   :  { %787 = vmatprep.subr.bf16.mxu0 %v896_v16  ;;  %v924_v60 = vld [vmem:[#allocation2 + $0x110] sm:$0xff]   ;;  %v925_v61 = vld [vmem:[#allocation2 + $0x148] sm:$0xff]   ;;  %v927_v63 = vld [vmem:[#allocation2 + $0x140] sm:$0xff]  }
  0x1d   :  { %808 = vmatpush3.bf16.msra.mxu1 %v895_v15  ;;  %v177_v45 = vrot.slane %v155_v42, %v146_v34  ;;  %v156_v47 = vcombine.high %v154_v44, %v154_v44  ;;  %v185_v48 = vcombine.high %v163_v43, %v163_v43  ;;  %v926_v62 = vld [vmem:[#allocation2 + $0x108] sm:$0xff]   ;;  %v928_v0 = vld [vmem:[#allocation2 + $0x100] sm:$0xff]   ;;  %v170_v1 = vrot.slane %v154_v44, %v146_v34  ;;  %v929_v2 = vld [vmem:[%s1037_s3 + $0x38] sm:$0xff]  }
  0x1e   :  { %809 = vmatprep.subr.bf16.mxu1 %v898_v18  ;;  %v930_v4 = vld [vmem:[%s1037_s3 + $0x30] sm:$0xff]   ;;  %v931_v5 = vld [vmem:[%s1037_s3 + $0x28] sm:$0xff]   ;;  %v932_v6 = vld [vmem:[%s1037_s3 + $0x20] sm:$0xff]  }
  0x1f   :  { %788 = vmatpush3.bf16.msra.mxu0 %v897_v17  ;;  %513 = vmatprep.mubr.bf16.mxu0 %v177_v45  ;;  %v186_v50 = vcombine.high %v177_v45, %v177_v45  ;;  %v184_v51 = vrot.slane %v156_v47, %v146_v34  ;;  %v933_v7 = vld [vmem:[%s1037_s3 + $0x18] sm:$0xff]   ;;  %v934_v8 = vld [vmem:[%s1037_s3 + $0x10] sm:$0xff]   ;;  %v935_v9 = vld [vmem:[%s1037_s3 + $0x8] sm:$0xff]  }
  0x20   :  { %789 = vmatprep.subr.bf16.mxu0 %v900_v20  ;;  %v936_v10 = vld [vmem:[%s1037_s3] sm:$0xff]  }
  0x21   :  { %810 = vmatpush3.bf16.msra.mxu1 %v899_v19  ;;  %553 = vmatprep.mubr.bf16.mxu1 %v186_v50  ;;  %v721_v20 = vld [vmem:[%s1036_s2] ss:$0 sm:$0xff] }
  0x22   :  { %811 = vmatprep.subr.bf16.mxu1 %v902_v25 }
  0x23   :  { %790 = vmatpush3.bf16.msra.mxu0 %v901_v24 }
  0x24   :  { %791 = vmatprep.subr.bf16.mxu0 %v904_v27 }
  0x25   :  { %812 = vmatpush3.bf16.msra.mxu1 %v903_v26 }
  0x26   :  { %813 = vmatprep.subr.bf16.mxu1 %v906_v31 }
  0x27   :  { %792 = vmatpush3.bf16.msra.mxu0 %v905_v30 }
  0x28   :  { %793 = vmatprep.subr.bf16.mxu0 %v908_v33 }
  0x29   :  { %814 = vmatpush3.bf16.msra.mxu1 %v907_v32  ;;  %v770_v32 = vld [vmem:[%s1038_s4] ss:$0 sm:$0xff] }
  0x2a   :  { %815 = vmatprep.subr.bf16.mxu1 %v910_v36 }
  0x2b   :  { %794 = vmatpush3.bf16.msra.mxu0 %v909_v35 }
  0x2c   :  { %823 = vmatprep.subr.bf16.mxu0 %v913_v41 }
  0x2d   :  { %816 = vmatpush3.bf16.msra.mxu1 %v912_v40 }
  0x2e   :  { %514 = vmatmul.mubr.bf16.vlgmr.msra.gmra.mxu0 %v163_v43  ;;  %854 = vmatprep.subr.bf16.mxu1 %v963_v3 }
  0x2f   :  { %824 = vmatpush3.bf16.msra.mxu0 %v914_v46  ;;  %593 = vmatprep.mubr.bf16.mxu0 %v184_v51 }
  0x30   :  { %554 = vmatmul.mubr.bf16.vlgmr.msra.gmra.mxu1 %v185_v48  ;;  %825 = vmatprep.subr.bf16.mxu0 %v915_v49 }
  0x31   :  { %855 = vmatpush3.bf16.msra.mxu1 %v929_v2  ;;  %870 = vmatprep.mubr.msk.bf16.mxu1 %vm964_vm0, %v963_v3 }
  0x32   :  { %856 = vmatprep.subr.bf16.mxu1 %v963_v3 }
  0x33   :  { %826 = vmatpush3.bf16.msra.mxu0 %v916_v52 }
  0x34   :  { %827 = vmatprep.subr.bf16.mxu0 %v917_v53 }
  0x35   :  { %857 = vmatpush3.bf16.msra.mxu1 %v930_v4 }
  0x36   :  { %858 = vmatprep.subr.bf16.mxu1 %v963_v3 }
  0x37   :  { %828 = vmatpush3.bf16.msra.mxu0 %v918_v54 }
  0x38   :  { %829 = vmatprep.subr.bf16.mxu0 %v919_v55 }
  0x39   :  { %859 = vmatpush3.bf16.msra.mxu1 %v931_v5 }
  0x3a   :  { %860 = vmatprep.subr.bf16.mxu1 %v963_v3 }
  0x3b   :  { %830 = vmatpush3.bf16.msra.mxu0 %v920_v56 }
  0x3c   :  { %831 = vmatprep.subr.bf16.mxu0 %v921_v57 }
  0x3d   :  { %861 = vmatpush3.bf16.msra.mxu1 %v932_v6 }
  0x3e   :  { %862 = vmatprep.subr.bf16.mxu1 %v963_v3 }
  0x3f   :  { %832 = vmatpush3.bf16.msra.mxu0 %v922_v58 }
  0x40   :  { %833 = vmatprep.subr.bf16.mxu0 %v923_v59 }
  0x41   :  { %863 = vmatpush3.bf16.msra.mxu1 %v933_v7 }
  0x42   :  { %864 = vmatprep.subr.bf16.mxu1 %v963_v3 }
  0x43   :  { %834 = vmatpush3.bf16.msra.mxu0 %v924_v60 }
  0x44   :  { %835 = vmatprep.subr.bf16.mxu0 %v925_v61 }
  0x45   :  { %865 = vmatpush3.bf16.msra.mxu1 %v934_v8 }
  0x46   :  { %866 = vmatprep.subr.bf16.mxu1 %v963_v3 }
  0x47   :  { %836 = vmatpush3.bf16.msra.mxu0 %v926_v62 }
  0x48   :  { %837 = vmatprep.subr.bf16.mxu0 %v927_v63 }
  0x49   :  { %867 = vmatpush3.bf16.msra.mxu1 %v935_v9 }
  0x4a   :  { %868 = vmatprep.subr.bf16.mxu1 %v963_v3 }
  0x4b   :  { %838 = vmatpush3.bf16.msra.mxu0 %v928_v0 }
  0x4d   :  { %869 = vmatpush3.bf16.msra.mxu1 %v936_v10 }
  0x4e   :  { %594 = vmatmul.mubr.bf16.vlgmr.msra.gmra.mxu0 %v170_v1 }
  0xee   :  { %v795_v11 = vpop.f32.mrf.mxu0 }
  0xf0   :  { %v796_v12 = vpop.f32.mrf.mxu0  ;;  %v817_v13 = vpop.f32.mrf.mxu1 }
  0xf1   :  { %v797_v19 = vadd.f32 %v796_v12, %v795_v11 }
  0xf2   :  { %v798_v14 = vpop.f32.mrf.mxu0  ;;  %v818_v15 = vpop.f32.mrf.mxu1 }
  0xf3   :  { %v516_v21 = vadd.f32 %v797_v19, %v721_v20  ;;  %v819_v22 = vadd.f32 %v818_v15, %v817_v13 }
  0xf4   :  { %v799_v16 = vpop.f32.mrf.mxu0  ;;  %v820_v17 = vpop.f32.mrf.mxu1 }
  0xf5   :  { %v556_v25 = vadd.f32 %v819_v22, %v516_v21 }
  0xf6   :  { %v821_v18 = vpop.f32.mrf.mxu1 }
 0x10e   :  { %v839_v23 = vpop.f32.mrf.mxu0 }
 0x110   :  { %v840_v24 = vpop.f32.mrf.mxu0 }
 0x111   :  { %v841_v26 = vadd.f32 %v840_v24, %v839_v23 }
 0x112   :  { %v842_v27 = vpop.f32.mrf.mxu0 }
 0x113   :  { %v596_v28 = vadd.f32 %v841_v26, %v556_v25 }
 0x114   :  { %v843_v29 = vpop.f32.mrf.mxu0 }
 0x115   :  { %v601_v30 = vmax.f32 %v596_v28, 0.0 }
 0x117   :  { %v602_v31 = vpack.c.bf16 %v601_v30, %v601_v30 }
 0x119   :  { %871 = vmatmul.mubr.bf16.vlgmr.msra.gmra.mxu1 %v602_v31 }
 0x1d9   :  { %v708_v33 = vpop.f32.mrf.mxu1 }
 0x1da   :  { %v709_v34 = vadd.f32 %v770_v32, %v708_v33 }
 0x1db   :  { %v872_v35 = vpop.f32.mrf.mxu1 }
 0x1dc   :  { %v714_v36 = vpack.c.bf16 %v709_v34, %v709_v34 }
 0x1dd   :  { %v711_v37 = vpop.f32.mrf.mxu1 }
 0x1de   :  { %715 = vst [vmem:[%s1039_s5] sm:$0x1] %v714_v36 }
 0x1df   :  { %v873_v38 = vpop.f32.mrf.mxu1 }
 0x1e0   :  { %720 = vsyncpa [#allocation3], 1 }

</bundles_post_ra>
